<compile_context>
chip_gen: v7x
topology: tpu7x:2x2x1
jax: 0.10.0
libtpu: 0.0.40
codegen_flags: <defaults>
</compile_context>

<pallas_src>
from functools import partial

import numpy as np
import jax
import jax.numpy as jnp
from jax.experimental import pallas as pl
from jax.experimental.pallas import tpu as pltpu

OUT1 = 8  # first adaptive pool output size (second stage pools 8 -> 1)


# ----------------------------------------------------------------------------
# Kernels
# ----------------------------------------------------------------------------
def _mean_kernel(x_ref, o_ref, acc_ref, *, inv_l):
    # Fast path (L % OUT1 == 0): fused two-stage pool == mean over L.
    # x_ref: (nb, C, tl); o_ref: (nb, C); acc_ref: (nb, C) f32 scratch.
    k = pl.program_id(1)

    @pl.when(k == 0)
    def _():
        acc_ref[...] = jnp.zeros_like(acc_ref)

    acc_ref[...] += jnp.sum(x_ref[...], axis=-1, dtype=jnp.float32)

    @pl.when(k == pl.num_programs(1) - 1)
    def _():
        o_ref[...] = (acc_ref[...] * inv_l).astype(o_ref.dtype)


def _weighted_kernel(x_ref, w_ref, o_ref, acc_ref):
    # General case (L % OUT1 != 0): weighted reduce with static per-element
    # weights.  Multiply stays in the input dtype; accumulation is f32.
    # x_ref: (nb, C, tl); w_ref: (1, 1, tl) in x.dtype; o_ref: (nb, C).
    k = pl.program_id(1)

    @pl.when(k == 0)
    def _():
        acc_ref[...] = jnp.zeros_like(acc_ref)

    acc_ref[...] += jnp.sum(x_ref[...] * w_ref[...], axis=-1, dtype=jnp.float32)

    @pl.when(k == pl.num_programs(1) - 1)
    def _():
        o_ref[...] = acc_ref[...].astype(o_ref.dtype)


# ----------------------------------------------------------------------------
# Host-side helpers
# ----------------------------------------------------------------------------
def _round_up(x, m):
    return ((x + m - 1) // m) * m


def _sublane(dtype):
    # Sublane packing tile: 8 (f32), 16 (bf16/f16), 32 (int8/fp8).
    return max(8, 32 // jnp.dtype(dtype).itemsize)


def _adaptive_weights(L, out1=OUT1):
    # Element j contributes 1/(bin_len * out1) for every stage-1 bin covering j
    # (bins may overlap when L % out1 != 0, matching PyTorch semantics).
    w = np.zeros((L,), np.float64)
    for i in range(out1):
        s = (i * L) // out1
        e = ((i + 1) * L + out1 - 1) // out1  # ceil
        w[s:e] += 1.0 / ((e - s) * out1)
    return w.reshape(1, 1, L)


def _choose_blocks(N, C, L, dtype, target_bytes=8 * 1024 * 1024):
    """Pick (nb, tl) from the padded VMEM footprint of a (nb, C, tl) block."""
    itemsize = jnp.dtype(dtype).itemsize
    pad_c = _round_up(C, _sublane(dtype))

    def blk_bytes(nb, tl):
        return nb * pad_c * _round_up(tl, 128) * itemsize

    per_row = blk_bytes(1, L)
    nb_raw = max(1, target_bytes // per_row)

    if nb_raw >= N:
        nb = N
        # Split the "parallel" axis into >=2 steps for v7x's 2 TensorCores
        # when legal (output block needs nb % 8 == 0 or nb == N).
        half = _round_up(-(-N // 2), 8)
        if half < N:
            nb = half
        return nb, L

    nb = max(8, (nb_raw // 8) * 8) if N > 8 else N
    nb = min(nb, N)
    if blk_bytes(nb, L) <= target_bytes:
        return nb, L

    # Rows too big for a full-L block at the minimum legal nb: tile L.
    # tl must be a multiple of 128 that divides L exactly (no padded garbage
    # entering the reduction); fall back to full L if none exists.
    best = None
    for tl in range(128, L, 128):
        if L % tl == 0 and blk_bytes(nb, tl) <= target_bytes:
            best = tl  # keep the largest tile that fits
    if best is None:
        for tl in range(128, L, 128):
            if L % tl == 0:
                best = tl
                break
    return nb, (best if best is not None else L)


def _vmem_need_bytes(nb, C, tl, x_dtype, w_dtype):
    itemsize = jnp.dtype(x_dtype).itemsize
    x_blk = nb * _round_up(C, _sublane(x_dtype)) * _round_up(tl, 128) * itemsize
    o_blk = _round_up(nb, 8) * _round_up(C, 128) * itemsize
    acc = _round_up(nb, 8) * _round_up(C, 128) * 4
    need = 2 * x_blk + 2 * o_blk + acc
    if w_dtype is not None:
        w_item = jnp.dtype(w_dtype).itemsize
        need += 2 * _sublane(w_dtype) * _round_up(tl, 128) * w_item
    return need


# ----------------------------------------------------------------------------
# Public entry point (matches Model.forward)
# ----------------------------------------------------------------------------
def adaptive_avg_pool_model(x):
    """x: (N, C, L). Returns (N, C, 1), matching Model.forward."""
    N, C, L = x.shape
    uniform = (L % OUT1 == 0)

    # Weights only needed in the non-uniform path; keep them in the input
    # dtype for half-precision inputs (multiply stays narrow, accum is f32).
    if uniform:
        w = None
        w_dtype = None
    else:
        w_dtype = x.dtype if jnp.dtype(x.dtype) in (
            jnp.dtype(jnp.bfloat16), jnp.dtype(jnp.float16)) else jnp.float32
        w = jnp.asarray(_adaptive_weights(L), dtype=w_dtype)

    nb, tl = _choose_blocks(N, C, L, x.dtype)
    grid = (pl.cdiv(N, nb), L // tl)

    cp_kwargs = dict(dimension_semantics=("parallel", "arbitrary"))
    need = _vmem_need_bytes(nb, C, tl, x.dtype, w_dtype)
    if need * 5 // 4 > 30 * 1024 * 1024:
        cp_kwargs["vmem_limit_bytes"] = int(need * 5 // 4) + (2 << 20)
    compiler_params = pltpu.CompilerParams(**cp_kwargs)

    out_shape = jax.ShapeDtypeStruct((N, C), x.dtype)
    x_spec = pl.BlockSpec((nb, C, tl), lambda n, k: (n, 0, k))
    out_spec = pl.BlockSpec((nb, C), lambda n, k: (n, 0))
    scratch = [pltpu.VMEM((nb, C), jnp.float32)]

    if uniform:
        out2d = pl.pallas_call(
            partial(_mean_kernel, inv_l=float(1.0 / L)),
            out_shape=out_shape,
            grid=grid,
            in_specs=[x_spec],
            out_specs=out_spec,
            scratch_shapes=scratch,
            compiler_params=compiler_params,
        )(x)
    else:
        w_spec = pl.BlockSpec((1, 1, tl), lambda n, k: (0, 0, k))
        out2d = pl.pallas_call(
            _weighted_kernel,
            out_shape=out_shape,
            grid=grid,
            in_specs=[x_spec, w_spec],
            out_specs=out_spec,
            scratch_shapes=scratch,
            compiler_params=compiler_params,
        )(x, w)

    return out2d.reshape(N, C, 1)


# ----------------------------------------------------------------------------
# Self-test
# ----------------------------------------------------------------------------
if __name__ == "__main__":
    key = jax.random.PRNGKey(0)
    # Small (N, C, L) input consistent with the 1-D pooling module.
    N, C, L = 2, 4, 16
    x = jax.random.normal(key, (N, C, L), dtype=jnp.float32)

    out = adaptive_avg_pool_model(x)
    out = jax.block_until_ready(out)

    # Reference: explicit two-stage adaptive pool (floor/ceil bin boundaries),
    # matching PyTorch's F.adaptive_avg_pool1d composition.
    ref_bins = []
    for i in range(OUT1):
        s = (i * L) // OUT1
        e = ((i + 1) * L + OUT1 - 1) // OUT1
        ref_bins.append(jnp.mean(x[..., s:e], axis=-1, keepdims=True))
    ref = jnp.mean(jnp.concatenate(ref_bins, axis=-1), axis=-1, keepdims=True)

    assert out.shape == (N, C, 1)
    assert jnp.allclose(out, ref, atol=1e-5, rtol=1e-5)

    # Also exercise the weighted (L % 8 != 0) path at a small odd length.
    L2 = 20
    x2 = jax.random.normal(jax.random.PRNGKey(1), (N, C, L2), dtype=jnp.float32)
    out2 = jax.block_until_ready(adaptive_avg_pool_model(x2))
    ref_bins2 = []
    for i in range(OUT1):
        s = (i * L2) // OUT1
        e = ((i + 1) * L2 + OUT1 - 1) // OUT1
        ref_bins2.append(jnp.mean(x2[..., s:e], axis=-1, keepdims=True))
    ref2 = jnp.mean(jnp.concatenate(ref_bins2, axis=-1), axis=-1, keepdims=True)
    assert jnp.allclose(out2, ref2, atol=1e-5, rtol=1e-5)

    print("KERNEL_OK")
</pallas_src>

<mosaic_0001>
module attributes {stable_mosaic.version = 11 : i64} {
  func.func @_mean_kernel(%arg0: i32, %arg1: i32, %arg2: memref<2x4x16xf32, #tpu.memory_space<vmem>>, %arg3: memref<2x4xf32, #tpu.memory_space<vmem>>, %arg4: memref<2x4xf32, #tpu.memory_space<vmem>>) attributes {dimension_semantics = [#tpu.dimension_semantics<parallel>, #tpu.dimension_semantics<arbitrary>], iteration_bounds = array<i64: 1, 1>, scalar_prefetch = 0 : i64, scratch_operands = 1 : i64, tpu.core_type = #tpu.core_type<tc>, window_params = [{transform_indices = @transform_0, window_bounds = array<i64: 2, 4, 16>}, {transform_indices = @transform_1, window_bounds = array<i64: 2, 4>}]} {
    %c0_i32 = arith.constant 0 : i32
    %0 = arith.cmpi eq, %arg1, %c0_i32 : i32
    %1 = arith.extui %0 : i1 to i32
    %c0_i32_0 = arith.constant 0 : i32
    %2 = arith.cmpi ne, %1, %c0_i32_0 : i32
    scf.if %2 {
      %cst_9 = arith.constant 0.000000e+00 : f32
      %11 = vector.broadcast %cst_9 : f32 to vector<2x4xf32>
      %c0_10 = arith.constant 0 : index
      %c0_11 = arith.constant 0 : index
      %12 = vector.load %arg4[%c0_10, %c0_11] : memref<2x4xf32, #tpu.memory_space<vmem>>, vector<2x4xf32>
      tpu.vector_store %arg4[%c0_10, %c0_11], %11 {strides = array<i32>} : memref<2x4xf32, #tpu.memory_space<vmem>>, vector<2x4xf32>,
    } else {
    }
    %c0 = arith.constant 0 : index
    %c0_1 = arith.constant 0 : index
    %3 = vector.load %arg4[%c0, %c0_1] : memref<2x4xf32, #tpu.memory_space<vmem>>, vector<2x4xf32>
    %c0_2 = arith.constant 0 : index
    %c0_3 = arith.constant 0 : index
    %c0_4 = arith.constant 0 : index
    %4 = vector.load %arg2[%c0_2, %c0_3, %c0_4] : memref<2x4x16xf32, #tpu.memory_space<vmem>>, vector<2x4x16xf32>
    %cst = arith.constant dense<0.000000e+00> : vector<2x4xf32>
    %5 = vector.multi_reduction <add>, %4, %cst [2] : vector<2x4x16xf32> to vector<2x4xf32>
    %6 = arith.addf %3, %5 : vector<2x4xf32>
    %c0_5 = arith.constant 0 : index
    %c0_6 = arith.constant 0 : index
    %7 = vector.load %arg4[%c0_5, %c0_6] : memref<2x4xf32, #tpu.memory_space<vmem>>, vector<2x4xf32>
    tpu.vector_store %arg4[%c0_5, %c0_6], %6 {strides = array<i32>} : memref<2x4xf32, #tpu.memory_space<vmem>>, vector<2x4xf32>,
    %c0_i32_7 = arith.constant 0 : i32
    %8 = arith.cmpi eq, %arg1, %c0_i32_7 : i32
    %9 = arith.extui %8 : i1 to i32
    %c0_i32_8 = arith.constant 0 : i32
    %10 = arith.cmpi ne, %9, %c0_i32_8 : i32
    scf.if %10 {
      %c0_9 = arith.constant 0 : index
      %c0_10 = arith.constant 0 : index
      %11 = vector.load %arg4[%c0_9, %c0_10] : memref<2x4xf32, #tpu.memory_space<vmem>>, vector<2x4xf32>
      %cst_11 = arith.constant 6.250000e-02 : f32
      %12 = vector.broadcast %cst_11 : f32 to vector<2x4xf32>
      %13 = arith.mulf %11, %12 : vector<2x4xf32>
      %c0_12 = arith.constant 0 : index
      %c0_13 = arith.constant 0 : index
      %14 = vector.load %arg3[%c0_12, %c0_13] : memref<2x4xf32, #tpu.memory_space<vmem>>, vector<2x4xf32>
      tpu.vector_store %arg3[%c0_12, %c0_13], %13 {strides = array<i32>} : memref<2x4xf32, #tpu.memory_space<vmem>>, vector<2x4xf32>,
    } else {
    }
    return
  }
  func.func @transform_0(%arg0: i32, %arg1: i32) -> (i32, i32, i32) {
    %c0_i32 = arith.constant 0 : i32
    %c0_i32_0 = arith.constant 0 : i32
    return %arg0, %c0_i32, %arg1 : i32, i32, i32
  }
  func.func @transform_1(%arg0: i32, %arg1: i32) -> (i32, i32) {
    %c0_i32 = arith.constant 0 : i32
    %c0_i32_0 = arith.constant 0 : i32
    return %arg0, %c0_i32 : i32, i32
  }
}

</mosaic_0001>

<bundles_post_ra>
// kernel: tpu_custom_call.1
= control target key start
LH: loop header
LB: loop body
LE: loop exit
PB: predicated region body
PF: predicated region fallthrough
CT: control target
= control target key end

     0   :  { %6 = vsyncpa [#allocation4], 0  ;;  %s173_s0 = inlined_call_operand.hbm [shape: f32[2,4,16], index: 0, kind: input, shape index: {}]   ;;  %s174_s1 = inlined_call_operand.hbm [shape: f32[2,4], index: 1, kind: output, shape index: {}]  }
   0x1   :  { %7 = vsyncpa [#allocation5], 0  ;;  %s131_s6 = smov [#allocation3]   ;;  %s83_s10 = scalar_lea.hbm %s173_s0, 128 }
   0x2   :  { %s13_s7 = sshll.u32 %s131_s6, 4  ;;  %p84_p0 = scmp.ne.s32.totalorder %s173_s0, %s83_s10  ;;  %s14_s7 = int_to_ptr.vmem [resolvable:$true] %s13_s7 }
   0x3   :  { %p87_p1 = scmp.lt.u32.totalorder %s83_s10, %s173_s0 }
   0x5   :  { %p89_p2 = pnand %p87_p1, %p84_p0 }
   0x7   :  { %92 = shalt.err (!%p89_p2)
}
   0x8   :  { %s93_s15 = scalar_lea.vmem %s14_s7, 128  ;;  %p98_p4 = scmp.lt.s32.totalorder %s14_s7, %s14_s7 }
   0x9   :  { %p94_p3 = scmp.ne.s32.totalorder %s14_s7, %s93_s15  ;;  %p99_p5 = scmp.lt.s32.totalorder %s93_s15, %s93_s15 }
   0xb   :  { %p100_p6 = por %p99_p5, %p98_p4 }
   0xd   :  { %p101_p7 = pnand %p100_p6, %p94_p3 }
   0xf   :  { %104 = shalt.err (!%p101_p7)
}
  0x10   :  { %s132_s16 = smov 64   ;;  %s133_s17 = smov 4  }
  0x11   :  { %19 = dma.hbm_to_vmem [thread:$0]  %s173_s0, 128, %s14_s7, [#allocation4], %s132_s16, %s132_s16, %s133_s17  }
  0x12   :  { %127 = dma.done.wait [#allocation4], 128  }
  0x13   :  { %128 = vsyncadd [#allocation4], 4294967168  ;;  %vm32_vm0 = vcmask 125952   ;;  %v30_v0 = vld [vmem:[#allocation3] sm:$0xf]  ;;  %vm27_vm1 = vcmask 25600   ;;  %v41_v5 = vlaneseq }
  0x14   :  { %v31_v1 = vld [vmem:[#allocation3 + $0x4] sm:$0xf]  ;;  %v33_v2 = vsel %vm32_vm0, %v30_v0, 0.0  ;;  %v134_v4 = vmov 0.0   ;;  %vm51_vm2 = vcmask 1041409   ;;  %s135_s0 = smov [#allocation6]  }
  0x15   :  { %34 = vadd.xlane.f32.xlu0 %v33_v2  ;;  %v36_v3 = vsel %vm32_vm0, %v31_v1, 0.0  ;;  %28 = vst.msk [vmem:[#allocation2] sm:$0x3] %vm27_vm1, %v134_v4  ;;  %v42_v6 = vand.u32 127, %v41_v5  ;;  %v44_v7 = vshrl.u32 %v41_v5, 7  ;;  %s69_s20 = sshll.u32 %s135_s0, 4  ;;  %s70_s20 = int_to_ptr.vmem [resolvable:$true] %s69_s20 }
  0x16   :  { %s105_s21 = scalar_lea.vmem %s70_s20, 32  ;;  %p110_p9 = scmp.lt.s32.totalorder %s70_s20, %s70_s20 }
  0x17   :  { %v45_v9 = vsub.s32 %v42_v6, %v44_v7  ;;  %p106_p8 = scmp.ne.s32.totalorder %s70_s20, %s105_s21  ;;  %p111_p10 = scmp.lt.s32.totalorder %s105_s21, %s105_s21 }
  0x19   :  { %37 = vadd.xlane.f32.xlu0 %v36_v3  ;;  %p112_p11 = por %p111_p10, %p110_p9 }
  0x1b   :  { %p113_p12 = pnand %p112_p11, %p106_p8 }
  0x1c   :  { %v29_v13 = vld [vmem:[#allocation2] sm:$0x3] }
  0xa2   :  { %v35_v8 = vpop.xlane.xlu0 %34 }
  0xa3   :  { %v46_v11 = vrot.slane %v35_v8, %v45_v9 }
  0xa6   :  { %v38_v10 = vpop.xlane.xlu0 %37 }
  0xa7   :  { %v50_v12 = vrot.slane %v38_v10, %v45_v9 }
  0xa9   :  { %v52_v14 = vsel %vm51_vm2, %v50_v12, %v46_v11 }
  0xaa   :  { %v54_v15 = vadd.f32 %v52_v14, %v29_v13 }
  0xac   :  { %56 = vst.msk [vmem:[#allocation2] sm:$0x3] %vm27_vm1, %v54_v15 }
  0xb3   :  { %v60_v16 = vld [vmem:[#allocation2] sm:$0x3] }
  0xb4   :  { %v61_v17 = vmul.f32 0.0625, %v60_v16 }
  0xb6   :  { %62 = vst.msk [vmem:[#allocation6] sm:$0x3] %vm27_vm1, %v61_v17 }
  0xb7   :  { %116 = shalt.err (!%p113_p12)
}
  0xb8   :  { %s117_s24 = scalar_lea.hbm %s174_s1, 32 }
  0xb9   :  { %p118_p13 = scmp.ne.s32.totalorder %s174_s1, %s117_s24  ;;  %p121_p0 = scmp.lt.u32.totalorder %s117_s24, %s174_s1 }
  0xbb   :  { %p123_p1 = pnand %p121_p0, %p118_p13 }
  0xbd   :  { %126 = shalt.err (!%p123_p1)
}
  0xbe   :  { %72 = dma.vmem_to_hbm [thread:$0]  %s70_s20, 32, %s174_s1, [#allocation5]  }
  0xbf   :  { %129 = dma.done.wait [#allocation5], 32  }
  0xc0   :  { %130 = vsyncadd [#allocation5], 4294967264 }
  0xc1   :  { %76 = vsyncpa [#allocation4], 1 }
  0xc2   :  { %77 = vsyncpa [#allocation5], 1 }

</bundles_post_ra>
